<compile_context>
chip_gen: v7x
topology: tpu7x:2x2x1
jax: 0.10.0
libtpu: 0.0.40
codegen_flags: <defaults>
</compile_context>

<pallas_src>
import functools

import jax
import jax.numpy as jnp
from jax import lax
from jax.experimental import pallas as pl
from jax.experimental.pallas import tpu as pltpu

_EPS = 1e-6  # matches nn.CosineSimilarity(dim=1, eps=1e-06)


def _round_up(x, m):
    return (x + m - 1) // m * m


def _ccl_kernel(x_ref, lbl_ref, w_ref, out_ref,
                cls_sum_ref, cls_cnt_ref, acc_ref,
                *, n_total, num_classes, tile_n):
    p = pl.program_id(0)          # 0 = class-stats pass, 1 = loss pass
    t = pl.program_id(1)          # tile index along N
    n_tiles = pl.num_programs(1)

    # Row-validity mask: neutralizes host padding rows and the partial last
    # tile (uses where so NaN/garbage in the padded region cannot propagate).
    row = t * tile_n + lax.broadcasted_iota(jnp.int32, (tile_n, 1), 0)
    valid = row < n_total                                       # [tile_n, 1] bool

    x = jnp.where(valid, x_ref[...].astype(jnp.float32), 0.0)   # [tile_n, D]
    lbl = lbl_ref[...]                                          # [tile_n, 1] int32
    cls_iota = lax.broadcasted_iota(jnp.int32, (tile_n, num_classes), 1)
    onehot = jnp.where(valid, (cls_iota == lbl).astype(jnp.float32), 0.0)

    @pl.when(jnp.logical_and(p == 0, t == 0))
    def _init():
        cls_sum_ref[...] = jnp.zeros_like(cls_sum_ref)
        cls_cnt_ref[...] = jnp.zeros_like(cls_cnt_ref)
        acc_ref[...] = jnp.zeros_like(acc_ref)

    @pl.when(p == 0)
    def _class_stats():
        # Per-class feature sums and counts via MXU contractions over rows
        # (contract dim 0 of both operands == onehot^T @ x), keeping the XLU
        # free for the lane reductions in pass 1.
        cls_sum_ref[...] += lax.dot_general(
            onehot, x, (((0,), (0,)), ((), ())),
            preferred_element_type=jnp.float32)                 # [C, D]
        cls_cnt_ref[...] += lax.dot_general(
            onehot, jnp.ones((tile_n, 1), jnp.float32), (((0,), (0,)), ((), ())),
            preferred_element_type=jnp.float32)                 # [C, 1]

    @pl.when(p == 1)
    def _loss():
        w = jnp.where(valid, w_ref[...].astype(jnp.float32), 0.0)
        # Gather this sample's class sum / count with an MXU onehot matmul.
        sum_ps = jnp.dot(onehot, cls_sum_ref[...],
                         preferred_element_type=jnp.float32)    # [tile_n, D]
        cnt_ps = jnp.dot(onehot, cls_cnt_ref[...],
                         preferred_element_type=jnp.float32)    # [tile_n, 1]
        mean_ps = sum_ps / jnp.maximum(cnt_ps, 1.0)             # class mean per row

        dot_xm = jnp.sum(x * mean_ps, axis=-1, keepdims=True)   # <x, m>
        x_norm = jnp.sqrt(jnp.sum(x * x, axis=-1, keepdims=True))
        m_norm = jnp.sqrt(jnp.sum(mean_ps * mean_ps, axis=-1, keepdims=True))
        cos = dot_xm / jnp.maximum(x_norm * m_norm, _EPS)
        diss = 1.0 - jnp.abs(cos)

        contrib = jnp.where(valid, w * diss, 0.0)
        acc_ref[...] += jnp.sum(contrib, keepdims=True)         # (1, 1)

        @pl.when(t == n_tiles - 1)
        def _finalize():
            out_ref[...] = acc_ref[...] / jnp.float32(n_total)


def causal_consistency_loss(flatten_features, data_label, weight, num_classes,
                            *, tile_n=None):
    """flatten_features: [N, D], data_label: [N] int, weight: [N] float."""
    n, d = flatten_features.shape
    itemsize = jnp.dtype(flatten_features.dtype).itemsize

    # Pad N to a multiple of 8 so every tile's sublane dim is layout-legal.
    n_pad = _round_up(max(n, 1), 8)
    feats = flatten_features                       # native dtype; cast in-kernel
    labels = data_label.astype(jnp.int32).reshape(n, 1)
    w = weight.astype(jnp.float32).reshape(n, 1)
    if n_pad != n:
        pad = n_pad - n
        feats = jnp.pad(feats, ((0, pad), (0, 0)))
        labels = jnp.pad(labels, ((0, pad), (0, 0)), constant_values=-1)
        w = jnp.pad(w, ((0, pad), (0, 0)))

    # Tile over N: big enough to amortize per-step overhead (~512 rows),
    # capped so a double-buffered feature tile stays well inside VMEM on
    # v5e (16 MiB scoped default) and v7x (32 MiB scoped / 64 MiB physical).
    if tile_n is None:
        rows_for_4mb = max(8, ((4 << 20) // max(d * itemsize, 1)) // 8 * 8)
        tile_n = min(512, rows_for_4mb, n_pad)
    tile_n = max(8, (int(tile_n) // 8) * 8)
    tile_n = min(tile_n, n_pad)
    n_tiles = pl.cdiv(n_pad, tile_n)

    kernel = functools.partial(_ccl_kernel, n_total=n,
                               num_classes=num_classes, tile_n=tile_n)

    cost = pl.CostEstimate(
        flops=int(4 * n * num_classes * d + 10 * n * d),
        transcendentals=int(3 * n),
        bytes_accessed=int(2 * n * d * itemsize + 4 * n * 4 + 4),
    )

    out = pl.pallas_call(
        kernel,
        out_shape=jax.ShapeDtypeStruct((1, 1), jnp.float32),
        grid=(2, n_tiles),
        in_specs=[
            pl.BlockSpec((tile_n, d), lambda p, t: (t, 0)),   # features
            pl.BlockSpec((tile_n, 1), lambda p, t: (t, 0)),   # labels
            pl.BlockSpec((tile_n, 1), lambda p, t: (t, 0)),   # weights
        ],
        out_specs=pl.BlockSpec((1, 1), lambda p, t: (0, 0)),
        scratch_shapes=[
            pltpu.VMEM((num_classes, d), jnp.float32),   # per-class feature sums
            pltpu.VMEM((num_classes, 1), jnp.float32),   # per-class counts
            pltpu.VMEM((1, 1), jnp.float32),             # running loss accumulator
        ],
        compiler_params=pltpu.CompilerParams(
            # Both axes carry sequential state (class stats / accumulator),
            # so they must stay "arbitrary" (single-core, in-order).
            dimension_semantics=("arbitrary", "arbitrary"),
            vmem_limit_bytes=32 * 1024 * 1024,
        ),
        cost_estimate=cost,
    )(feats, labels, w)
    return out[0, 0]


def _reference(feats, labels, weight, num_classes, eps=_EPS):
    """Pure-JAX mirror of the PyTorch per-class loop."""
    n = feats.shape[0]
    feats = feats.astype(jnp.float32)
    weight = weight.astype(jnp.float32)
    total = jnp.float32(0.0)
    for i in range(num_classes):
        mask = labels == i
        cnt = jnp.sum(mask.astype(jnp.float32))
        mean = jnp.sum(jnp.where(mask[:, None], feats, 0.0), axis=0)
        mean = mean / jnp.maximum(cnt, 1.0)
        dots = feats @ mean
        denom = jnp.maximum(jnp.linalg.norm(feats, axis=1) * jnp.linalg.norm(mean), eps)
        diss = 1.0 - jnp.abs(dots / denom)
        total = total + jnp.sum(jnp.where(mask, diss * weight, 0.0))
    return total / n


if __name__ == "__main__":
    key = jax.random.PRNGKey(0)
    k1, k2, k3 = jax.random.split(key, 3)
    N, D, NUM_CLASSES = 20, 32, 4            # N not a tile multiple -> tests masking
    feats = jax.random.normal(k1, (N, D), dtype=jnp.float32)
    labels = jax.random.randint(k2, (N,), 0, NUM_CLASSES, dtype=jnp.int32)
    weight = jax.random.uniform(k3, (N,), dtype=jnp.float32)

    out = causal_consistency_loss(feats, labels, weight, NUM_CLASSES, tile_n=8)
    out = jax.block_until_ready(out)

    ref = _reference(feats, labels, weight, NUM_CLASSES)
    # tolerance leaves headroom for MXU bf16-pass rounding of f32 matmuls
    assert jnp.allclose(out, ref, rtol=1e-2, atol=1e-3), (out, ref)
    print("KERNEL_OK")
</pallas_src>

<mosaic_0001>
module attributes {stable_mosaic.version = 11 : i64} {
  func.func @_ccl_kernel(%arg0: i32, %arg1: i32, %arg2: memref<8x32xf32, #tpu.memory_space<vmem>>, %arg3: memref<8x1xi32, #tpu.memory_space<vmem>>, %arg4: memref<8x1xf32, #tpu.memory_space<vmem>>, %arg5: memref<1x1xf32, #tpu.memory_space<vmem>>, %arg6: memref<4x32xf32, #tpu.memory_space<vmem>>, %arg7: memref<4x1xf32, #tpu.memory_space<vmem>>, %arg8: memref<1x1xf32, #tpu.memory_space<vmem>>) attributes {dimension_semantics = [#tpu.dimension_semantics<arbitrary>, #tpu.dimension_semantics<arbitrary>], iteration_bounds = array<i64: 2, 3>, scalar_prefetch = 0 : i64, scratch_operands = 3 : i64, tpu.core_type = #tpu.core_type<tc>, window_params = [{transform_indices = @transform_0, window_bounds = array<i64: 8, 32>}, {transform_indices = @transform_1, window_bounds = array<i64: 8, 1>}, {transform_indices = @transform_2, window_bounds = array<i64: 8, 1>}, {pipeline_mode = #tpu.pipeline_mode<synchronous>, transform_indices = @transform_3, window_bounds = array<i64: 1, 1>}]} {
    %c8_i32 = arith.constant 8 : i32
    %0 = arith.muli %arg1, %c8_i32 : i32
    %1 = tpu.iota {dimensions = array<i32: 0>} : vector<8x1xi32>
    %2 = vector.broadcast %0 : i32 to vector<8x1xi32>
    %3 = arith.addi %2, %1 : vector<8x1xi32>
    %c20_i32 = arith.constant 20 : i32
    %4 = vector.broadcast %c20_i32 : i32 to vector<8x1xi32>
    %5 = arith.cmpi slt, %3, %4 : vector<8x1xi32>
    %c0 = arith.constant 0 : index
    %c0_0 = arith.constant 0 : index
    %6 = vector.load %arg2[%c0, %c0_0] : memref<8x32xf32, #tpu.memory_space<vmem>>, vector<8x32xf32>
    %cst = arith.constant 0.000000e+00 : f32
    %7 = vector.shape_cast %5 : vector<8x1xi1> to vector<8x1xi1>
    %8 = vector.broadcast %7 : vector<8x1xi1> to vector<8x32xi1>
    %9 = vector.broadcast %cst : f32 to vector<8x32xf32>
    %10 = arith.select %8, %6, %9 : vector<8x32xi1>, vector<8x32xf32>
    %c0_1 = arith.constant 0 : index
    %c0_2 = arith.constant 0 : index
    %11 = vector.load %arg3[%c0_1, %c0_2] : memref<8x1xi32, #tpu.memory_space<vmem>>, vector<8x1xi32>
    %12 = tpu.iota {dimensions = array<i32: 1>} : vector<8x4xi32>
    %13 = vector.broadcast %11 : vector<8x1xi32> to vector<8x4xi32>
    %14 = arith.cmpi eq, %12, %13 : vector<8x4xi32>
    %15 = arith.extui %14 : vector<8x4xi1> to vector<8x4xi32>
    %16 = arith.sitofp %15 : vector<8x4xi32> to vector<8x4xf32>
    %cst_3 = arith.constant 0.000000e+00 : f32
    %17 = vector.shape_cast %5 : vector<8x1xi1> to vector<8x1xi1>
    %18 = vector.broadcast %17 : vector<8x1xi1> to vector<8x4xi1>
    %19 = vector.broadcast %cst_3 : f32 to vector<8x4xf32>
    %20 = arith.select %18, %16, %19 : vector<8x4xi1>, vector<8x4xf32>
    %c0_i32 = arith.constant 0 : i32
    %21 = arith.cmpi eq, %arg0, %c0_i32 : i32
    %c0_i32_4 = arith.constant 0 : i32
    %22 = arith.cmpi eq, %arg1, %c0_i32_4 : i32
    %23 = arith.andi %21, %22 : i1
    %24 = arith.extui %23 : i1 to i32
    %c0_i32_5 = arith.constant 0 : i32
    %25 = arith.cmpi ne, %24, %c0_i32_5 : i32
    scf.if %25 {
      %cst_9 = arith.constant 0.000000e+00 : f32
      %32 = vector.broadcast %cst_9 : f32 to vector<4x32xf32>
      %c0_10 = arith.constant 0 : index
      %c0_11 = arith.constant 0 : index
      %33 = vector.load %arg6[%c0_10, %c0_11] : memref<4x32xf32, #tpu.memory_space<vmem>>, vector<4x32xf32>
      tpu.vector_store %arg6[%c0_10, %c0_11], %32 {strides = array<i32>} : memref<4x32xf32, #tpu.memory_space<vmem>>, vector<4x32xf32>,
      %cst_12 = arith.constant 0.000000e+00 : f32
      %34 = vector.broadcast %cst_12 : f32 to vector<4x1xf32>
      %c0_13 = arith.constant 0 : index
      %c0_14 = arith.constant 0 : index
      %35 = vector.load %arg7[%c0_13, %c0_14] : memref<4x1xf32, #tpu.memory_space<vmem>>, vector<4x1xf32>
      tpu.vector_store %arg7[%c0_13, %c0_14], %34 {strides = array<i32>} : memref<4x1xf32, #tpu.memory_space<vmem>>, vector<4x1xf32>,
      %cst_15 = arith.constant 0.000000e+00 : f32
      %36 = vector.broadcast %cst_15 : f32 to vector<1x1xf32>
      %c0_16 = arith.constant 0 : index
      %c0_17 = arith.constant 0 : index
      %37 = vector.load %arg8[%c0_16, %c0_17] : memref<1x1xf32, #tpu.memory_space<vmem>>, vector<1x1xf32>
      tpu.vector_store %arg8[%c0_16, %c0_17], %36 {strides = array<i32>} : memref<1x1xf32, #tpu.memory_space<vmem>>, vector<1x1xf32>,
    } else {
    }
    %c0_i32_6 = arith.constant 0 : i32
    %26 = arith.cmpi eq, %arg0, %c0_i32_6 : i32
    %27 = arith.extui %26 : i1 to i32
    %c0_i32_7 = arith.constant 0 : i32
    %28 = arith.cmpi ne, %27, %c0_i32_7 : i32
    scf.if %28 {
      %c0_9 = arith.constant 0 : index
      %c0_10 = arith.constant 0 : index
      %32 = vector.load %arg6[%c0_9, %c0_10] : memref<4x32xf32, #tpu.memory_space<vmem>>, vector<4x32xf32>
      %cst_11 = arith.constant dense<0.000000e+00> : vector<4x32xf32>
      %33 = tpu.matmul %20, %10, %cst_11 {dimension_numbers = #tpu.dot_dimension_numbers<[0], [0], [1], [1], [0, 1, 1, 1], [], []>} : vector<8x4xf32>, vector<8x32xf32>, vector<4x32xf32> -> vector<4x32xf32>
      %34 = arith.addf %32, %33 : vector<4x32xf32>
      %c0_12 = arith.constant 0 : index
      %c0_13 = arith.constant 0 : index
      %35 = vector.load %arg6[%c0_12, %c0_13] : memref<4x32xf32, #tpu.memory_space<vmem>>, vector<4x32xf32>
      tpu.vector_store %arg6[%c0_12, %c0_13], %34 {strides = array<i32>} : memref<4x32xf32, #tpu.memory_space<vmem>>, vector<4x32xf32>,
      %c0_14 = arith.constant 0 : index
      %c0_15 = arith.constant 0 : index
      %36 = vector.load %arg7[%c0_14, %c0_15] : memref<4x1xf32, #tpu.memory_space<vmem>>, vector<4x1xf32>
      %cst_16 = arith.constant 1.000000e+00 : f32
      %37 = vector.broadcast %cst_16 : f32 to vector<8x1xf32>
      %cst_17 = arith.constant dense<0.000000e+00> : vector<4x1xf32>
      %38 = tpu.matmul %20, %37, %cst_17 {dimension_numbers = #tpu.dot_dimension_numbers<[0], [0], [1], [1], [0, 1, 1, 1], [], []>} : vector<8x4xf32>, vector<8x1xf32>, vector<4x1xf32> -> vector<4x1xf32>
      %39 = arith.addf %36, %38 : vector<4x1xf32>
      %c0_18 = arith.constant 0 : index
      %c0_19 = arith.constant 0 : index
      %40 = vector.load %arg7[%c0_18, %c0_19] : memref<4x1xf32, #tpu.memory_space<vmem>>, vector<4x1xf32>
      tpu.vector_store %arg7[%c0_18, %c0_19], %39 {strides = array<i32>} : memref<4x1xf32, #tpu.memory_space<vmem>>, vector<4x1xf32>,
    } else {
    }
    %c1_i32 = arith.constant 1 : i32
    %29 = arith.cmpi eq, %arg0, %c1_i32 : i32
    %30 = arith.extui %29 : i1 to i32
    %c0_i32_8 = arith.constant 0 : i32
    %31 = arith.cmpi ne, %30, %c0_i32_8 : i32
    scf.if %31 {
      %c0_9 = arith.constant 0 : index
      %c0_10 = arith.constant 0 : index
      %32 = vector.load %arg4[%c0_9, %c0_10] : memref<8x1xf32, #tpu.memory_space<vmem>>, vector<8x1xf32>
      %cst_11 = arith.constant 0.000000e+00 : f32
      %33 = vector.broadcast %cst_11 : f32 to vector<8x1xf32>
      %34 = arith.select %5, %32, %33 : vector<8x1xi1>, vector<8x1xf32>
      %c0_12 = arith.constant 0 : index
      %c0_13 = arith.constant 0 : index
      %35 = vector.load %arg6[%c0_12, %c0_13] : memref<4x32xf32, #tpu.memory_space<vmem>>, vector<4x32xf32>
      %cst_14 = arith.constant dense<0.000000e+00> : vector<8x32xf32>
      %36 = tpu.matmul %20, %35, %cst_14 {dimension_numbers = #tpu.dot_dimension_numbers<[1], [0], [0], [1], [0, 0, 1, 1], [], []>} : vector<8x4xf32>, vector<4x32xf32>, vector<8x32xf32> -> vector<8x32xf32>
      %c0_15 = arith.constant 0 : index
      %c0_16 = arith.constant 0 : index
      %37 = vector.load %arg7[%c0_15, %c0_16] : memref<4x1xf32, #tpu.memory_space<vmem>>, vector<4x1xf32>
      %cst_17 = arith.constant dense<0.000000e+00> : vector<8x1xf32>
      %38 = tpu.matmul %20, %37, %cst_17 {dimension_numbers = #tpu.dot_dimension_numbers<[1], [0], [0], [1], [0, 0, 1, 1], [], []>} : vector<8x4xf32>, vector<4x1xf32>, vector<8x1xf32> -> vector<8x1xf32>
      %cst_18 = arith.constant 1.000000e+00 : f32
      %39 = vector.broadcast %cst_18 : f32 to vector<8x1xf32>
      %40 = arith.maximumf %38, %39 : vector<8x1xf32>
      %41 = vector.broadcast %40 : vector<8x1xf32> to vector<8x32xf32>
      %42 = arith.divf %36, %41 : vector<8x32xf32>
      %43 = arith.mulf %10, %42 : vector<8x32xf32>
      %cst_19 = arith.constant dense<0.000000e+00> : vector<8xf32>
      %44 = vector.multi_reduction <add>, %43, %cst_19 [1] : vector<8x32xf32> to vector<8xf32>
      %45 = vector.shape_cast %44 : vector<8xf32> to vector<8x1xf32>
      %46 = arith.mulf %10, %10 : vector<8x32xf32>
      %cst_20 = arith.constant dense<0.000000e+00> : vector<8xf32>
      %47 = vector.multi_reduction <add>, %46, %cst_20 [1] : vector<8x32xf32> to vector<8xf32>
      %48 = vector.shape_cast %47 : vector<8xf32> to vector<8x1xf32>
      %49 = math.sqrt %48 : vector<8x1xf32>
      %50 = arith.mulf %42, %42 : vector<8x32xf32>
      %cst_21 = arith.constant dense<0.000000e+00> : vector<8xf32>
      %51 = vector.multi_reduction <add>, %50, %cst_21 [1] : vector<8x32xf32> to vector<8xf32>
      %52 = vector.shape_cast %51 : vector<8xf32> to vector<8x1xf32>
      %53 = math.sqrt %52 : vector<8x1xf32>
      %54 = arith.mulf %49, %53 : vector<8x1xf32>
      %cst_22 = arith.constant 9.99999997E-7 : f32
      %55 = vector.broadcast %cst_22 : f32 to vector<8x1xf32>
      %56 = arith.maximumf %54, %55 : vector<8x1xf32>
      %57 = arith.divf %45, %56 : vector<8x1xf32>
      %58 = math.absf %57 : vector<8x1xf32>
      %cst_23 = arith.constant 1.000000e+00 : f32
      %59 = vector.broadcast %cst_23 : f32 to vector<8x1xf32>
      %60 = arith.subf %59, %58 : vector<8x1xf32>
      %61 = arith.mulf %34, %60 : vector<8x1xf32>
      %cst_24 = arith.constant 0.000000e+00 : f32
      %62 = vector.broadcast %cst_24 : f32 to vector<8x1xf32>
      %63 = arith.select %5, %61, %62 : vector<8x1xi1>, vector<8x1xf32>
      %c0_25 = arith.constant 0 : index
      %c0_26 = arith.constant 0 : index
      %64 = vector.load %arg8[%c0_25, %c0_26] : memref<1x1xf32, #tpu.memory_space<vmem>>, vector<1x1xf32>
      %65 = vector.shape_cast %63 : vector<8x1xf32> to vector<1x8x1xf32>
      %cst_27 = arith.constant dense<0.000000e+00> : vector<1xf32>
      %66 = vector.multi_reduction <add>, %65, %cst_27 [1, 2] : vector<1x8x1xf32> to vector<1xf32>
      %67 = vector.shape_cast %66 : vector<1xf32> to vector<1x1x1xf32>
      %68 = vector.extract %67[0, 0, 0] : f32 from vector<1x1x1xf32>
      %69 = vector.broadcast %68 : f32 to vector<1x1xf32>
      %70 = arith.addf %64, %69 : vector<1x1xf32>
      %c0_28 = arith.constant 0 : index
      %c0_29 = arith.constant 0 : index
      %71 = vector.load %arg8[%c0_28, %c0_29] : memref<1x1xf32, #tpu.memory_space<vmem>>, vector<1x1xf32>
      tpu.vector_store %arg8[%c0_28, %c0_29], %70 {strides = array<i32>} : memref<1x1xf32, #tpu.memory_space<vmem>>, vector<1x1xf32>,
      %c2_i32 = arith.constant 2 : i32
      %72 = arith.cmpi eq, %arg1, %c2_i32 : i32
      %73 = arith.extui %72 : i1 to i32
      %c0_i32_30 = arith.constant 0 : i32
      %74 = arith.cmpi ne, %73, %c0_i32_30 : i32
      scf.if %74 {
        %c0_31 = arith.constant 0 : index
        %c0_32 = arith.constant 0 : index
        %75 = vector.load %arg8[%c0_31, %c0_32] : memref<1x1xf32, #tpu.memory_space<vmem>>, vector<1x1xf32>
        %cst_33 = arith.constant 2.000000e+01 : f32
        %76 = vector.broadcast %cst_33 : f32 to vector<1x1xf32>
        %77 = arith.divf %75, %76 : vector<1x1xf32>
        %c0_34 = arith.constant 0 : index
        %c0_35 = arith.constant 0 : index
        %78 = vector.load %arg5[%c0_34, %c0_35] : memref<1x1xf32, #tpu.memory_space<vmem>>, vector<1x1xf32>
        tpu.vector_store %arg5[%c0_34, %c0_35], %77 {strides = array<i32>} : memref<1x1xf32, #tpu.memory_space<vmem>>, vector<1x1xf32>,
      } else {
      }
    } else {
    }
    return
  }
  func.func @transform_0(%arg0: i32, %arg1: i32) -> (i32, i32) {
    %c0_i32 = arith.constant 0 : i32
    %c0_i32_0 = arith.constant 0 : i32
    return %arg1, %c0_i32 : i32, i32
  }
  func.func @transform_1(%arg0: i32, %arg1: i32) -> (i32, i32) {
    %c0_i32 = arith.constant 0 : i32
    %c0_i32_0 = arith.constant 0 : i32
    return %arg1, %c0_i32 : i32, i32
  }
  func.func @transform_2(%arg0: i32, %arg1: i32) -> (i32, i32) {
    %c0_i32 = arith.constant 0 : i32
    %c0_i32_0 = arith.constant 0 : i32
    return %arg1, %c0_i32 : i32, i32
  }
  func.func @transform_3(%arg0: i32, %arg1: i32) -> (i32, i32) {
    %c0_i32 = arith.constant 0 : i32
    %c0_i32_0 = arith.constant 0 : i32
    %c0_i32_1 = arith.constant 0 : i32
    return %c0_i32, %c0_i32_0 : i32, i32
  }
}

</mosaic_0001>

<bundles_post_ra>
// kernel: tpu_custom_call.1
= control target key start
LH: loop header
LB: loop body
LE: loop exit
PB: predicated region body
PF: predicated region fallthrough
CT: control target
= control target key end

     0   :  { %8 = vsyncpa [#allocation6], 0  ;;  %s946_s12 = smov 0   ;;  %s948_s13 = smov 0   ;;  %s1069_s0 = inlined_call_operand.vmem [shape: f32[24,32], index: 0, kind: input, shape index: {}]   ;;  %s1070_s1 = inlined_call_operand.vmem [shape: s32[24,1], index: 1, kind: input, shape index: {}]   ;;  %s1071_s2 = inlined_call_operand.vmem [shape: f32[24,1], index: 2, kind: input, shape index: {}]   ;;  %s1072_s3 = inlined_call_operand.hbm [shape: f32[1,1], index: 3, kind: output, shape index: {}]  }
   0x1   :  { %s950_s14 = smov 0   ;;  %s952_s15 = smov 0  }
   0x2   :  { %s954_s16 = smov 0  }
   0x3 LB: > { %s727_s17 = sadd.s32 4294967295, %s914_s16   ;;  %s23_s18 = sadd.s32 1, %s906_s14  ;;  %s914_s16 = sphi %s954_s16, %s14_s16   ;;  %s910_s15 = sphi %s952_s15, %s1077_s15   ;;  %s906_s14 = sphi %s950_s14, %s1076_s14   ;;  %s902_s13 = sphi %s948_s13, %s1075_s13   ;;  %s898_s12 = sphi %s946_s12, %s1074_s12  }
   0x4   : > { %p24_p0 = scmp.ge.s32.totalorder %s23_s18, 3  ;;  %s26_s19 = sadd.s32 1, %s910_s15 }
   0x5   : > { %p730_p1 = scmp.ge.s32.totalorder %s914_s16, 1  ;;  %p162_p2 = scmp.lt.s32.totalorder %s914_s16, 7 }
   0x6   : > { %s1079_s18 = smov (%p24_p0, %s23_s18), 0  ;;  %s1081_s19 = smov (!%p24_p0, %s26_s19), %s910_s15 }
   0x7   : > { %p163_p3 = pnand %p730_p1, %p162_p2  ;;  %p28_p4 = scmp.ge.s32.totalorder %s1081_s19, 2 }
   0x8   : > { %p188_p5 = scmp.lt.s32.totalorder (!%p163_p3), %s898_s12, 2  ;;  %s734_s20 = sshll.u32 (!%p163_p3), %s898_s12, 3  ;;  %v201_v0 = vlaneseq (!%p163_p3)  ;;  %v916_v1 = vmov (!%p163_p3), 0   ;;  %v917_v10 = vmov (!%p163_p3), 0.0  }
   0x9   : > { %s1083_s19 = smov (%p28_p4, %s1081_s19), 0  ;;  %166 = sbr.rel (%p163_p3) target bundleno = 1289 (0x509), region = 32 }
   0xa   : > { %836 = vset.pattern.permute.xlu0 (!%p163_p3), %v916_v1  ;;  %v203_v2 = vstv (!%p163_p3), %s734_s20  ;;  %v202_v3 = vshrl.u32 (!%p163_p3), %v201_v0, 7  ;;  %p220_p6 = scmp.eq.s32.totalorder (!%p163_p3), %s902_s13, 0  ;;  %p221_p7 = scmp.eq.s32.totalorder (!%p163_p3), %s898_s12, 0  ;;  %v212_v8 = vand.u32 (!%p163_p3), 127, %v201_v0 }
   0xc   : > { %v986_v4 = vadd.s32 (!%p163_p3), %v203_v2, %v202_v3  ;;  %p222_p8 = pnand (!%p163_p3), %p221_p7, %p220_p6 }
   0xe   : > { %vm205_vm0 = vcmp.lt.s32.totalorder (!%p163_p3), %v986_v4, 20 }
  0x10   : > { %s189_s21 = scalar_select %p188_p5, %s898_s12, 2 }
  0x11   : > { %vm226_vm2 = vcmask (!%p222_p8), 257024   ;;  %vm228_vm3 = vcmask (!%p222_p8), 3072   ;;  %vm230_vm4 = vcmask (!%p222_p8), 0   ;;  %v918_v13 = vmov (!%p222_p8), 0.0  }
  0x12   : > { %s984_s22 = sshll.u32 %s189_s21, 3  ;;  %227 = vst.msk [vmem:[#allocation2] sm:$0xf] (!%p222_p8), %vm226_vm2, %v918_v13 }
  0x13   : > { %s195_s25 = scalar_lea.vmem %s1070_s1, %s984_s22  ;;  %s199_s28 = scalar_lea.vmem %s1071_s2, %s984_s22  ;;  %229 = vst.msk [vmem:[#allocation3] sm:$0xf] (!%p222_p8), %vm228_vm3, %v918_v13 }
  0x14   : > { %v210_v5 = vld [vmem:[%s195_s25] sm:$0xff]  ;;  %s191_s4 = scalar_lea.vmem %s1069_s0, %s984_s22  ;;  %231 = vst.msk [vmem:[#allocation4] sm:$0x1] (!%p222_p8), %vm230_vm4, %v918_v13 }
  0x15   : > { %214 = vperm.xlu0 %836, %v210_v5   ;;  %v206_v6 = vld [vmem:[%s191_s4] sm:$0xff] }
  0x16   : > { %v1005_v7 = vsel %vm205_vm0, %v206_v6, 0.0 }
  0x91   : > { %225 = sbr.rel (%p222_p8) target bundleno = 152 (0x98), region = 36 }
  0x94   : > { %v215_v9 = vpop.permute.xlu0 %214 }
  0x95   : > { %vm216_vm1 = vcmp.eq.s32.totalorder %v212_v8, %v215_v9 }
  0x96   : > { %v735_v11 = vsel %vm216_vm1, 1.0, %v917_v10 }
  0x97   : > { %v219_v12 = vsel %vm205_vm0, %v735_v11, 0.0 }
  0x98 PF: > { %p736_p9 = scmp.ne.s32.totalorder %s902_s13, 0 }
  0x99   : > { %236 = vxpose.xlu0.b32.start.end [1/1] (short) (narrow) (!%p736_p9), %v219_v12, 8  ;;  %v919_v14 = vmov (!%p736_p9), 0.0   ;;  %vm920_vm5 = vmmov (!%p736_p9), 0   ;;  %v921_v15 = vmov (!%p736_p9), 1.0   ;;  %vm268_vm6 = vcmask (!%p736_p9), 64512  }
  0x9a   : > { %234 = sbr.rel (%p736_p9) target bundleno = 498 (0x1f2), region = 40  ;;  %758 = vmatprep.subr.mxu0 (!%p736_p9), %v919_v14  ;;  %763 = vmatprep.subr.mxu1 (!%p736_p9), %v919_v14  ;;  %v235_v17 = vld [vmem:[#allocation2] sm:$0xf] (!%p736_p9)  ;;  %v345_v18 = vld [vmem:[#allocation3] sm:$0xf] (!%p736_p9)  ;;  %vm343_vm7 = vcmask (!%p736_p9), 257024  }
  0x9b   : > { %759 = vmatpush3.msk.msra.mxu0 (!%p736_p9), %vm205_vm0, %v206_v6  ;;  %760 = vmatprep.mubr.msk.f32.mxu0 (!%p736_p9), %vm920_vm5, %v919_v14  ;;  %vm417_vm8 = vcmask (!%p736_p9), 3072  }
  0x9c   : > { %764 = vmatpush3.msra.mxu1 (!%p736_p9), %v921_v15  ;;  %765 = vmatprep.mubr.msk.f32.mxu1 (!%p736_p9), %vm920_vm5, %v919_v14 }
 0x119   : > { %v252_v16 = vpop.trf.xlu0 }
 0x11a   : > { %761 = vmatmul.mubr.msk.f32.vlgmr.msra.gmra.mrb[0].mxu0 %vm268_vm6, %v252_v16  ;;  %766 = vmatmul.mubr.msk.f32.vlgmr.msra.gmra.mrb[0].mxu1 %vm268_vm6, %v252_v16 }
 0x1ed   : > { %v338_v19 = vpop.f32.mrb[0].mxu0  ;;  %v412_v20 = vpop.f32.mrb[0].mxu1 }
 0x1ee   : > { %v342_v21 = vadd.f32 %v338_v19, %v235_v17  ;;  %v416_v22 = vadd.f32 %v412_v20, %v345_v18  ;;  %v762_v23 = vpop.f32.mrb[1].mxu0  ;;  %v767_v24 = vpop.f32.mrb[1].mxu1 }
 0x1f0   : > { %344 = vst.msk [vmem:[#allocation2] sm:$0xf] %vm343_vm7, %v342_v21 }
 0x1f1   : > { %418 = vst.msk [vmem:[#allocation3] sm:$0xf] %vm417_vm8, %v416_v22 }
 0x1f2 PF: > { %p740_p10 = scmp.ne.s32.totalorder %s902_s13, 1 }
 0x1f3   : > { %vm430_vm9 = vcmask (!%p740_p10), 1043456   ;;  %vm426_vm10 = vcmask (!%p740_p10), 31744   ;;  %v922_v26 = vmov (!%p740_p10), 0.0   ;;  %vm923_vm11 = vmmov (!%p740_p10), 0   ;;  %v423_v60 = vld [vmem:[%s199_s28] sm:$0xff] (!%p740_p10)  ;;  %p745_p11 = scmp.ne.s32.totalorder (!%p740_p10), %s898_s12, 2 }
 0x1f4   : > { %422 = sbr.rel (%p740_p10) target bundleno = 1264 (0x4f0), region = 44  ;;  %773 = vmatprep.subr.mxu1 (!%p740_p10), %v922_v26  ;;  %775 = vmatprep.mubr.msk.f32.mxu1 (!%p740_p10), %vm923_vm11, %v922_v26  ;;  %v924_v28 = vmov (!%p740_p10), 0   ;;  %v591_v34 = vmul.f32 (!%p740_p10), %v1005_v7, %v1005_v7  ;;  %vm587_vm12 = vcmask (!%p740_p10), 261120   ;;  %v424_v62 = vsel (!%p740_p10), %vm205_vm0, %v423_v60, 0.0  ;;  %v621_v11 = vld [vmem:[#allocation4] sm:$0x1] (!%p740_p10) }
 0x1f5   : > { %768 = vmatprep.subr.mxu0 (!%p740_p10), %v922_v26  ;;  %770 = vmatprep.mubr.msk.f32.mxu0 (!%p740_p10), %vm923_vm11, %v922_v26  ;;  %vm622_vm2 = vcmask (!%p740_p10), 7168   ;;  %vm635_vm3 = vcmask (!%p740_p10), 0  }
 0x1f6   : > { %837 = vset.pattern.permute.xlu0 (!%p740_p10), %v924_v28  ;;  %v592_v35 = vsel (!%p740_p10), %vm587_vm12, %v591_v34, 0.0 }
 0x1f7   : > { %v425_v27 = vld [vmem:[#allocation2] sm:$0xf] (!%p740_p10) }
 0x1f8   : > { %v504_v25 = vld [vmem:[#allocation3] sm:$0xf] (!%p740_p10)  ;;  %769 = vmatpush3.msk.msra.mxu0 (!%p740_p10), %vm430_vm9, %v425_v27 }
 0x1f9   : > { %774 = vmatpush3.msk.msra.mxu1 (!%p740_p10), %vm430_vm9, %v504_v25  ;;  %771 = vmatmul.mubr.msk.f32.vlgmr.msra.gmra.mrb[0].mxu0 (!%p740_p10), %vm426_vm10, %v219_v12 }
 0x1fa   : > { %776 = vmatmul.mubr.msk.f32.vlgmr.msra.gmra.mrb[0].mxu1 (!%p740_p10), %vm426_vm10, %v219_v12 }
 0x2cc   : > { %v500_v32 = vpop.f32.mrb[0].mxu0 }
 0x2cd   : > { %v574_v29 = vpop.f32.mrb[0].mxu1  ;;  %v772_v33 = vpop.f32.mrb[1].mxu0 }
 0x2ce   : > { %v578_v30 = vmax.f32 %v574_v29, 1.0  ;;  %v777_v31 = vpop.f32.mrb[1].mxu1 }
 0x2d0   : > { %581 = vperm.xlu0 %837, %v578_v30  }
 0x2ef   : > { %593 = vadd.xlane.f32.xlu0 %v592_v35 }
 0x34f   : > { %v582_v36 = vpop.permute.xlu0 %581 }
 0x350   : > { %838 = vrcp.f32 %v582_v36 }
 0x35a   : > { %v839_v37 = vpop.eup %838 }
 0x35b   : > { %v585_v38 = vmul.f32 %v839_v37, %v500_v32 }
 0x35d   : > { %v602_v39 = vmul.f32 %v585_v38, %v585_v38  ;;  %v586_v41 = vmul.f32 %v585_v38, %v1005_v7 }
 0x35f   : > { %v603_v40 = vsel %vm587_vm12, %v602_v39, 0.0  ;;  %v588_v42 = vsel %vm587_vm12, %v586_v41, 0.0 }
 0x360   : > { %604 = vadd.xlane.f32.xlu1 %v603_v40 }
 0x364   : > { %589 = vadd.xlane.f32.xlu1 %v588_v42 }
 0x37c   : > { %v594_v43 = vpop.xlane.xlu0 %593 }
 0x37d   : > { %840 = vrsqrt.f32 %v594_v43  ;;  %vm597_vm13 = vcmp.eq.f32.partialorder %v594_v43, inf  ;;  %v600_v48 = vand.u32 2147483648, %v594_v43  ;;  %vm599_vm14 = vcmp.eq.f32.partialorder %v594_v43, 0.0 }
 0x387   : > { %v841_v45 = vpop.eup %840 }
 0x388   : > { %v596_v46 = vmul.f32 %v841_v45, %v594_v43 }
 0x38a   : > { %v598_v49 = vsel %vm597_vm13, %v594_v43, %v596_v46 }
 0x38b   : > { %v601_v53 = vsel %vm599_vm14, %v600_v48, %v598_v49 }
 0x3ed   : > { %v605_v44 = vpop.xlane.xlu1 %604 }
 0x3ee   : > { %842 = vrsqrt.f32 %v605_v44  ;;  %vm608_vm15 = vcmp.eq.f32.partialorder %v605_v44, inf  ;;  %v611_v51 = vand.u32 2147483648, %v605_v44  ;;  %vm610_vm1 = vcmp.eq.f32.partialorder %v605_v44, 0.0 }
 0x3f1   : > { %v590_v58 = vpop.xlane.xlu1 %589 }
 0x3f8   : > { %v843_v47 = vpop.eup %842 }
 0x3f9   : > { %v607_v50 = vmul.f32 %v843_v47, %v605_v44 }
 0x3fb   : > { %v609_v52 = vsel %vm608_vm15, %v605_v44, %v607_v50 }
 0x3fc   : > { %v612_v54 = vsel %vm610_vm1, %v611_v51, %v609_v52 }
 0x3fd   : > { %v613_v55 = vmul.f32 %v612_v54, %v601_v53 }
 0x3ff   : > { %v614_v56 = vmax.f32 %v613_v55, 1e-06 }
 0x401   : > { %844 = vrcp.f32 %v614_v56 }
 0x40b   : > { %v845_v57 = vpop.eup %844 }
 0x40c   : > { %v616_v59 = vmul.f32 %v845_v57, %v590_v58 }
 0x40e   : > { %v617_v61 = vand.u32 2147483647, %v616_v59 }
 0x410   : > { %v618_v63 = vsub.f32 1.0, %v617_v61 }
 0x412   : > { %v619_v0 = vmul.f32 %v618_v63, %v424_v62 }
 0x414   : > { %v620_v1 = vsel %vm205_vm0, %v619_v0, 0.0 }
 0x415   : > { %v623_v2 = vsel %vm622_vm2, %v620_v1, 0.0 }
 0x416   : > { %624 = vadd.xlane.f32.xlu1 %v623_v2 }
 0x4a3   : > { %v625_v3 = vpop.xlane.xlu1 %624 }
 0x4a4   : > { %v626_v5 = vrot.slane %v625_v3, 4 }
 0x4a6   : > { %v627_v6 = vadd.f32 %v626_v5, %v625_v3 }
 0x4a8   : > { %v628_v7 = vrot.slane %v627_v6, 2 }
 0x4aa   : > { %v629_v8 = vadd.f32 %v628_v7, %v627_v6 }
 0x4ac   : > { %v630_v9 = vrot.slane %v629_v8, 1 }
 0x4ae   : > { %v631_v10 = vadd.f32 %v630_v9, %v629_v8 }
 0x4b0   : > { %778 = vpush %v631_v10 }
 0x4df   : > { %640 = sbr.rel (%p745_p11) target bundleno = 1264 (0x4f0), region = 48 }
 0x4e1   : > { %s779_s7 = spop %778 }
 0x4e2   : > { %v633_v12 = vstv %s779_s7 }
 0x4e3   : > { %v634_v13 = vadd.f32 %v633_v12, %v621_v11 }
 0x4e5   : > { %636 = vst.msk [vmem:[#allocation4] sm:$0x1] %vm635_vm3, %v634_v13 }
 0x4ec   : > { %v641_v4 = vld [vmem:[#allocation4] sm:$0x1] }
 0x4ed   : > { %v643_v14 = vmul.f32 0.05, %v641_v4 }
 0x4ef   : > { %644 = vst.msk [vmem:[#allocation5] sm:$0x1] %vm635_vm3, %v643_v14 }
 0x4f0 PF: > { %p1028_p12 = scmp.eq.s32.totalorder %s727_s17, 5  ;;  %s925_s9 = smov [#allocation5]  }
 0x4f1   : > { %s652_s10 = sshll.u32 %s925_s9, 4  ;;  %s653_s10 = int_to_ptr.vmem [resolvable:$true] %s652_s10 }
 0x4f2   : > { %s846_s11 = scalar_lea.vmem %s653_s10, 16  ;;  %s852_s12 = scalar_lea.vmem %s653_s10, 32 }
 0x4f3   : > { %p847_p13 = scmp.ne.s32.totalorder %s653_s10, %s846_s11  ;;  %p853_p2 = scmp.lt.s32.totalorder %s653_s10, %s653_s10 }
 0x4f4   : > { %p854_p3 = scmp.lt.s32.totalorder %s852_s12, %s846_s11 }
 0x4f5   : > { %p848_p0 = pnand %p847_p13, %p1028_p12 }
 0x4f6   : > { %p855_p4 = por %p854_p3, %p853_p2 }
 0x4f7   : > { %p849_p1 = pneg %p848_p0 }
 0x4f9   : > { %p856_p5 = pnand %p855_p4, %p849_p1 }
 0x4fb   : > { %859 = shalt.err (!%p856_p5)
}
 0x4fc   : > { %s860_s20 = scalar_lea.hbm %s1072_s3, 16 }
 0x4fd   : > { %p861_p6 = scmp.ne.s32.totalorder %s1072_s3, %s860_s20  ;;  %p866_p9 = scmp.lt.u32.totalorder %s860_s20, %s1072_s3 }
 0x4ff   : > { %p862_p7 = pnand %p861_p6, %p1028_p12 }
 0x501   : > { %p863_p8 = pneg %p862_p7 }
 0x503   : > { %p868_p10 = pnand %p866_p9, %p863_p8 }
 0x505   : > { %871 = shalt.err (!%p868_p10)
}
 0x506   : > { %781 = dma.vmem_to_hbm [thread:$0]  (%p1028_p12), %s653_s10, 16, %s1072_s3, [#allocation6]  }
 0x507   : > { %893 = dma.done.wait (%p1028_p12), [#allocation6], 16  }
 0x508   : > { %895 = vsyncadd (%p1028_p12), [#allocation6], 4294967280 }
 0x509 PF: > { %s14_s16 = sadd.s32 1, %s914_s16   ;;  %s1074_s12 = smov %s906_s14 }
 0x50a   : > { %p11_p11 = scmp.ge.s32.totalorder %s14_s16, 8   ;;  %s1075_s13 = smov %s910_s15 }
 0x50b   : > { %s1076_s14 = smov %s1079_s18  ;;  %s1077_s15 = smov %s1083_s19 }
 0x50c   :  { %13 = sbr.rel (!%p11_p11) target bundleno = 3 (0x3), region = 81 }
 0x513   :  { %665 = vsyncpa [#allocation6], 1 }
 0x514   :  { %667 = vsyncpa [#allocation6 + $0x1], 1 }

</bundles_post_ra>
